<compile_context>
chip_gen: v7x
topology: tpu7x:2x2x1
jax: 0.10.0
libtpu: 0.0.40
codegen_flags: <defaults>
</compile_context>

<pallas_src>
import functools

import jax
import jax.numpy as jnp
import numpy as np
from jax.experimental import pallas as pl
from jax.experimental.pallas import tpu as pltpu


def _round_up(x, m):
    return ((x + m - 1) // m) * m


# ---------------------------------------------------------------------------
# Fused sincos: one shared range reduction, two short polynomials, quadrant
# select.  Accurate to a few f32 ulps for |x| up to a few thousand (same
# Cody-Waite pi/2 split as cephes sinf/cosf).
# ---------------------------------------------------------------------------
_TWO_OVER_PI = 0.6366197723675814
# pi/2 split into three f32-exact terms (2x the cephes pi/4 split).
_PIO2_1 = 1.5703125
_PIO2_2 = 4.837512969970703125e-4
_PIO2_3 = 7.54978995489188216e-8


def _sincos(x):
    """Return (sin(x), cos(x)) for f32 x, sharing a single range reduction."""
    k = jnp.floor(x * _TWO_OVER_PI + 0.5)                       # nearest int as f32
    r = ((x - k * _PIO2_1) - k * _PIO2_2) - k * _PIO2_3         # |r| <= pi/4
    z = r * r
    # minimax polynomials on |r| <= pi/4 (cephes sinf / cosf coefficients)
    s_poly = r + r * z * (
        -1.6666654611e-1 + z * (8.3321608736e-3 + z * (-1.9515295891e-4)))
    c_poly = 1.0 - 0.5 * z + z * z * (
        4.166664568298827e-2 + z * (-1.388731625493765e-3 + z * 2.443315711809948e-5))
    q = k.astype(jnp.int32) & 3
    swap = (q & 1) != 0                   # odd quadrants swap sin/cos
    sin_b = jnp.where(swap, c_poly, s_poly)
    cos_b = jnp.where(swap, s_poly, c_poly)
    sin_x = jnp.where((q & 2) != 0, -sin_b, sin_b)          # q in {2,3}
    cos_x = jnp.where(((q + 1) & 2) != 0, -cos_b, cos_b)    # q in {1,2}
    return sin_x, cos_x


# ---------------------------------------------------------------------------
# Kernels
# ---------------------------------------------------------------------------
def _complex_exp_kernel(f_re_ref, f_im_ref, omega_ref, t_ref, o_ref):
    # phase = omega * t : (1, tn) * (tb, 1) -> (tb, tn)
    phase = omega_ref[...] * t_ref[...]
    s, c = _sincos(phase)
    # Re(F * exp(i*phase)) = Re(F)*cos(phase) - Im(F)*sin(phase)
    o_ref[...] = (f_re_ref[...] * c - f_im_ref[...] * s).astype(o_ref.dtype)


def _complex_exp_polar_kernel(amp_ref, phi_ref, omega_ref, t_ref, o_ref):
    # out = |F| * cos(omega*t + arg(F)) -- preferred when F is reused across
    # many t samples (single output product; compute-bound v7x win).
    phase = omega_ref[...] * t_ref[...] + phi_ref[...]
    _, c = _sincos(phase)
    o_ref[...] = (amp_ref[...] * c).astype(o_ref.dtype)


# ---------------------------------------------------------------------------
# Launcher: 2D (i, j) grid over (B, N); ragged tails via partial blocks.
# ---------------------------------------------------------------------------
def _launch(kernel, x0, x1, omega, t, *, out_dtype=jnp.float32,
            tb_max=256, tn_max=1024):
    B, N = x0.shape
    x0 = jnp.asarray(x0, jnp.float32)
    x1 = jnp.asarray(x1, jnp.float32)
    omega_2d = jnp.asarray(omega, jnp.float32).reshape(1, N)
    t_2d = jnp.asarray(t, jnp.float32).reshape(B, 1)

    # (8,128)-aligned lane-dense tiles.  Ragged tails are handled by Pallas
    # partial-block semantics: OOB reads feed garbage into cos/sin but the
    # corresponding OOB stores are dropped, so nothing wrong reaches HBM.
    tb = min(tb_max, _round_up(B, 8))
    tn = min(tn_max, _round_up(N, 128))
    # Guarantee >= 2 grid blocks along a "parallel" axis whenever the problem
    # exceeds one minimal tile, so both v7x TensorCores get work.
    if pl.cdiv(B, tb) * pl.cdiv(N, tn) < 2:
        if N > 128:
            tn = _round_up(pl.cdiv(N, 2), 128)
        elif B > 8:
            tb = _round_up(pl.cdiv(B, 2), 8)
    grid = (pl.cdiv(B, tb), pl.cdiv(N, tn))

    return pl.pallas_call(
        kernel,
        out_shape=jax.ShapeDtypeStruct((B, N), out_dtype),
        grid=grid,
        in_specs=[
            pl.BlockSpec((tb, tn), lambda i, j: (i, j)),
            pl.BlockSpec((tb, tn), lambda i, j: (i, j)),
            # omega only varies with the lane-tile index j; t only with i,
            # so their blocks are not re-fetched along the other axis.
            pl.BlockSpec((1, tn), lambda i, j: (0, j)),
            pl.BlockSpec((tb, 1), lambda i, j: (i, 0)),
        ],
        out_specs=pl.BlockSpec((tb, tn), lambda i, j: (i, j)),
        compiler_params=pltpu.CompilerParams(
            # Pure elementwise: both axes independent -> megacore can shard.
            dimension_semantics=("parallel", "parallel"),
            # ~6 MiB double-buffered footprint at the largest tiles; 32 MiB
            # leaves generous headroom on every generation (incl. v7x 64 MiB).
            vmem_limit_bytes=32 * 1024 * 1024,
        ),
    )(x0, x1, omega_2d, t_2d)


# ---------------------------------------------------------------------------
# Public API
# ---------------------------------------------------------------------------
@functools.partial(jax.jit, static_argnames=("out_dtype",))
def complex_exponential_forward_split(f_re, f_im, omega, t, out_dtype=jnp.float32):
    """Preferred entry point: F carried as two f32 arrays (no complex de-interleave).

    `out_dtype=jnp.bfloat16` narrows output HBM traffic (mem-bound v5e lever);
    all phase/trig math stays in f32.
    """
    return _launch(_complex_exp_kernel, f_re, f_im, omega, t, out_dtype=out_dtype)


def complex_exponential_forward(F, omega, t):
    """Convenience wrapper accepting complex F (shape (B, N)).

    TODO(synk): the ideal path would bitcast complex64 -> interleaved f32 and
    de-interleave inside the kernel (zero extra HBM passes), but
    lax.bitcast_convert_type does not support complex dtypes, so this wrapper
    still pays one real/imag extraction pass.  Callers that can carry F as
    separate real/imag (or amp/phase) arrays should use the split/polar entry
    points, which avoid it entirely.
    """
    f_re = jnp.real(F)
    f_im = jnp.imag(F)
    return complex_exponential_forward_split(f_re, f_im, omega, t)


def complex_exponential_precompute_polar(F):
    """One-time precompute (amp, phi) when F is reused across many t samples."""
    f_re = jnp.real(F)
    f_im = jnp.imag(F)
    amp = jnp.sqrt(f_re * f_re + f_im * f_im).astype(jnp.float32)
    phi = jnp.arctan2(f_im, f_re).astype(jnp.float32)
    return amp, phi


@functools.partial(jax.jit, static_argnames=("out_dtype",))
def complex_exponential_forward_polar(amp, phi, omega, t, out_dtype=jnp.float32):
    """out = amp * cos(omega*t + phi): single trig product per element."""
    return _launch(_complex_exp_polar_kernel, amp, phi, omega, t, out_dtype=out_dtype)


# TODO(synk): torch `.requires_grad_(True)` has no Pallas equivalent (autograd
# bookkeeping); gradients in JAX come from jax.grad on these wrappers.


if __name__ == "__main__":
    key = jax.random.PRNGKey(0)
    k1, k2, k3 = jax.random.split(key, 3)

    B = 8          # number of time samples (batch)
    N_OMEGA = 128  # number of plane-wave frequencies

    # Deterministic synthetic inputs.
    f_re = jax.random.normal(k1, (B, N_OMEGA), dtype=jnp.float32)
    f_im = jax.random.normal(k2, (B, N_OMEGA), dtype=jnp.float32)
    F = f_re + 1j * f_im                                   # complex64 amplitude
    omega = jnp.linspace(1.0, 10.0, N_OMEGA, dtype=jnp.float32)
    t = jax.random.uniform(k3, (B, 1), dtype=jnp.float32)  # time samples

    ref = jnp.real(F * jnp.exp(1j * omega.reshape(1, N_OMEGA) * t.reshape(B, 1)))

    # 1) split (re/im) path -- main kernel (fused sincos).
    out = complex_exponential_forward_split(f_re, f_im, omega, t)
    out = jax.block_until_ready(out)
    np.testing.assert_allclose(np.asarray(out), np.asarray(ref), atol=1e-5, rtol=1e-5)

    # 2) complex-input convenience wrapper.
    out_c = jax.block_until_ready(complex_exponential_forward(F, omega, t))
    np.testing.assert_allclose(np.asarray(out_c), np.asarray(ref), atol=1e-5, rtol=1e-5)

    # 3) amplitude/phase (single-cos) path.
    amp, phi = complex_exponential_precompute_polar(F)
    out_p = jax.block_until_ready(complex_exponential_forward_polar(amp, phi, omega, t))
    np.testing.assert_allclose(np.asarray(out_p), np.asarray(ref), atol=1e-4, rtol=1e-4)

    # 4) non-(8,128)-multiple shape -> exercises partial-block (no pad/slice) path.
    Bs, Ns = 5, 96
    f_re_s = f_re[:Bs, :Ns]
    f_im_s = f_im[:Bs, :Ns]
    omega_s = omega[:Ns]
    t_s = t[:Bs]
    ref_s = jnp.real((f_re_s + 1j * f_im_s)
                     * jnp.exp(1j * omega_s.reshape(1, Ns) * t_s.reshape(Bs, 1)))
    out_s = jax.block_until_ready(
        complex_exponential_forward_split(f_re_s, f_im_s, omega_s, t_s))
    np.testing.assert_allclose(np.asarray(out_s), np.asarray(ref_s), atol=1e-5, rtol=1e-5)

    # 5) shape big enough to trigger the ">=2 parallel blocks" split (v7x megacore).
    Bb, Nb = 16, 512
    f_re_b = jax.random.normal(k1, (Bb, Nb), dtype=jnp.float32)
    f_im_b = jax.random.normal(k2, (Bb, Nb), dtype=jnp.float32)
    omega_b = jnp.linspace(1.0, 10.0, Nb, dtype=jnp.float32)
    t_b = jax.random.uniform(k3, (Bb, 1), dtype=jnp.float32)
    ref_b = jnp.real((f_re_b + 1j * f_im_b)
                     * jnp.exp(1j * omega_b.reshape(1, Nb) * t_b.reshape(Bb, 1)))
    out_b = jax.block_until_ready(
        complex_exponential_forward_split(f_re_b, f_im_b, omega_b, t_b))
    np.testing.assert_allclose(np.asarray(out_b), np.asarray(ref_b), atol=1e-5, rtol=1e-5)

    print("KERNEL_OK")
</pallas_src>

<mosaic_0001>
module attributes {stable_mosaic.version = 11 : i64} {
  func.func @_complex_exp_kernel(%arg0: i32, %arg1: i32, %arg2: memref<8x128xf32, #tpu.memory_space<vmem>>, %arg3: memref<8x128xf32, #tpu.memory_space<vmem>>, %arg4: memref<1x128xf32, #tpu.memory_space<vmem>>, %arg5: memref<8x1xf32, #tpu.memory_space<vmem>>, %arg6: memref<8x128xf32, #tpu.memory_space<vmem>>) attributes {dimension_semantics = [#tpu.dimension_semantics<parallel>, #tpu.dimension_semantics<parallel>], iteration_bounds = array<i64: 1, 1>, scalar_prefetch = 0 : i64, scratch_operands = 0 : i64, tpu.core_type = #tpu.core_type<tc>, window_params = [{transform_indices = @transform_0, window_bounds = array<i64: 8, 128>}, {transform_indices = @transform_1, window_bounds = array<i64: 8, 128>}, {transform_indices = @transform_2, window_bounds = array<i64: 1, 128>}, {transform_indices = @transform_3, window_bounds = array<i64: 8, 1>}, {transform_indices = @transform_4, window_bounds = array<i64: 8, 128>}]} {
    %c0 = arith.constant 0 : index
    %c0_0 = arith.constant 0 : index
    %0 = vector.load %arg4[%c0, %c0_0] : memref<1x128xf32, #tpu.memory_space<vmem>>, vector<1x128xf32>
    %c0_1 = arith.constant 0 : index
    %c0_2 = arith.constant 0 : index
    %1 = vector.load %arg5[%c0_1, %c0_2] : memref<8x1xf32, #tpu.memory_space<vmem>>, vector<8x1xf32>
    %2 = vector.broadcast %0 : vector<1x128xf32> to vector<8x128xf32>
    %3 = vector.broadcast %1 : vector<8x1xf32> to vector<8x128xf32>
    %4 = arith.mulf %2, %3 : vector<8x128xf32>
    %cst = arith.constant 0.636619746 : f32
    %5 = vector.broadcast %cst : f32 to vector<8x128xf32>
    %6 = arith.mulf %4, %5 : vector<8x128xf32>
    %cst_3 = arith.constant 5.000000e-01 : f32
    %7 = vector.broadcast %cst_3 : f32 to vector<8x128xf32>
    %8 = arith.addf %6, %7 : vector<8x128xf32>
    %9 = math.floor %8 : vector<8x128xf32>
    %cst_4 = arith.constant 1.5703125 : f32
    %10 = vector.broadcast %cst_4 : f32 to vector<8x128xf32>
    %11 = arith.mulf %9, %10 : vector<8x128xf32>
    %12 = arith.subf %4, %11 : vector<8x128xf32>
    %cst_5 = arith.constant 4.83751297E-4 : f32
    %13 = vector.broadcast %cst_5 : f32 to vector<8x128xf32>
    %14 = arith.mulf %9, %13 : vector<8x128xf32>
    %15 = arith.subf %12, %14 : vector<8x128xf32>
    %cst_6 = arith.constant 7.549790e-08 : f32
    %16 = vector.broadcast %cst_6 : f32 to vector<8x128xf32>
    %17 = arith.mulf %9, %16 : vector<8x128xf32>
    %18 = arith.subf %15, %17 : vector<8x128xf32>
    %19 = arith.mulf %18, %18 : vector<8x128xf32>
    %20 = arith.mulf %18, %19 : vector<8x128xf32>
    %cst_7 = arith.constant -1.95152956E-4 : f32
    %21 = vector.broadcast %cst_7 : f32 to vector<8x128xf32>
    %22 = arith.mulf %19, %21 : vector<8x128xf32>
    %cst_8 = arith.constant 0.00833216123 : f32
    %23 = vector.broadcast %cst_8 : f32 to vector<8x128xf32>
    %24 = arith.addf %23, %22 : vector<8x128xf32>
    %25 = arith.mulf %19, %24 : vector<8x128xf32>
    %cst_9 = arith.constant -0.166666552 : f32
    %26 = vector.broadcast %cst_9 : f32 to vector<8x128xf32>
    %27 = arith.addf %26, %25 : vector<8x128xf32>
    %28 = arith.mulf %20, %27 : vector<8x128xf32>
    %29 = arith.addf %18, %28 : vector<8x128xf32>
    %cst_10 = arith.constant 5.000000e-01 : f32
    %30 = vector.broadcast %cst_10 : f32 to vector<8x128xf32>
    %31 = arith.mulf %30, %19 : vector<8x128xf32>
    %cst_11 = arith.constant 1.000000e+00 : f32
    %32 = vector.broadcast %cst_11 : f32 to vector<8x128xf32>
    %33 = arith.subf %32, %31 : vector<8x128xf32>
    %34 = arith.mulf %19, %19 : vector<8x128xf32>
    %cst_12 = arith.constant 2.44331568E-5 : f32
    %35 = vector.broadcast %cst_12 : f32 to vector<8x128xf32>
    %36 = arith.mulf %19, %35 : vector<8x128xf32>
    %cst_13 = arith.constant -0.00138873165 : f32
    %37 = vector.broadcast %cst_13 : f32 to vector<8x128xf32>
    %38 = arith.addf %37, %36 : vector<8x128xf32>
    %39 = arith.mulf %19, %38 : vector<8x128xf32>
    %cst_14 = arith.constant 0.0416666456 : f32
    %40 = vector.broadcast %cst_14 : f32 to vector<8x128xf32>
    %41 = arith.addf %40, %39 : vector<8x128xf32>
    %42 = arith.mulf %34, %41 : vector<8x128xf32>
    %43 = arith.addf %33, %42 : vector<8x128xf32>
    %44 = arith.fptosi %9 : vector<8x128xf32> to vector<8x128xi32>
    %c3_i32 = arith.constant 3 : i32
    %45 = vector.broadcast %c3_i32 : i32 to vector<8x128xi32>
    %46 = arith.andi %44, %45 : vector<8x128xi32>
    %c1_i32 = arith.constant 1 : i32
    %47 = vector.broadcast %c1_i32 : i32 to vector<8x128xi32>
    %48 = arith.andi %46, %47 : vector<8x128xi32>
    %c0_i32 = arith.constant 0 : i32
    %49 = vector.broadcast %c0_i32 : i32 to vector<8x128xi32>
    %50 = arith.cmpi ne, %48, %49 : vector<8x128xi32>
    %51 = arith.select %50, %43, %29 : vector<8x128xi1>, vector<8x128xf32>
    %52 = arith.select %50, %29, %43 : vector<8x128xi1>, vector<8x128xf32>
    %c2_i32 = arith.constant 2 : i32
    %53 = vector.broadcast %c2_i32 : i32 to vector<8x128xi32>
    %54 = arith.andi %46, %53 : vector<8x128xi32>
    %c0_i32_15 = arith.constant 0 : i32
    %55 = vector.broadcast %c0_i32_15 : i32 to vector<8x128xi32>
    %56 = arith.cmpi ne, %54, %55 : vector<8x128xi32>
    %cst_16 = arith.constant 0.000000e+00 : f32
    %57 = vector.broadcast %cst_16 : f32 to vector<8x128xf32>
    %58 = arith.subf %57, %51 : vector<8x128xf32>
    %59 = arith.select %56, %58, %51 : vector<8x128xi1>, vector<8x128xf32>
    %c1_i32_17 = arith.constant 1 : i32
    %60 = vector.broadcast %c1_i32_17 : i32 to vector<8x128xi32>
    %61 = arith.addi %46, %60 : vector<8x128xi32>
    %c2_i32_18 = arith.constant 2 : i32
    %62 = vector.broadcast %c2_i32_18 : i32 to vector<8x128xi32>
    %63 = arith.andi %61, %62 : vector<8x128xi32>
    %c0_i32_19 = arith.constant 0 : i32
    %64 = vector.broadcast %c0_i32_19 : i32 to vector<8x128xi32>
    %65 = arith.cmpi ne, %63, %64 : vector<8x128xi32>
    %cst_20 = arith.constant 0.000000e+00 : f32
    %66 = vector.broadcast %cst_20 : f32 to vector<8x128xf32>
    %67 = arith.subf %66, %52 : vector<8x128xf32>
    %68 = arith.select %65, %67, %52 : vector<8x128xi1>, vector<8x128xf32>
    %c0_21 = arith.constant 0 : index
    %c0_22 = arith.constant 0 : index
    %69 = vector.load %arg2[%c0_21, %c0_22] : memref<8x128xf32, #tpu.memory_space<vmem>>, vector<8x128xf32>
    %70 = arith.mulf %69, %68 : vector<8x128xf32>
    %c0_23 = arith.constant 0 : index
    %c0_24 = arith.constant 0 : index
    %71 = vector.load %arg3[%c0_23, %c0_24] : memref<8x128xf32, #tpu.memory_space<vmem>>, vector<8x128xf32>
    %72 = arith.mulf %71, %59 : vector<8x128xf32>
    %73 = arith.subf %70, %72 : vector<8x128xf32>
    %c0_25 = arith.constant 0 : index
    %c0_26 = arith.constant 0 : index
    %74 = vector.load %arg6[%c0_25, %c0_26] : memref<8x128xf32, #tpu.memory_space<vmem>>, vector<8x128xf32>
    tpu.vector_store %arg6[%c0_25, %c0_26], %73 {strides = array<i32>} : memref<8x128xf32, #tpu.memory_space<vmem>>, vector<8x128xf32>,
    return
  }
  func.func @transform_0(%arg0: i32, %arg1: i32) -> (i32, i32) {
    %c0_i32 = arith.constant 0 : i32
    return %arg0, %arg1 : i32, i32
  }
  func.func @transform_1(%arg0: i32, %arg1: i32) -> (i32, i32) {
    %c0_i32 = arith.constant 0 : i32
    return %arg0, %arg1 : i32, i32
  }
  func.func @transform_2(%arg0: i32, %arg1: i32) -> (i32, i32) {
    %c0_i32 = arith.constant 0 : i32
    %c0_i32_0 = arith.constant 0 : i32
    return %c0_i32, %arg1 : i32, i32
  }
  func.func @transform_3(%arg0: i32, %arg1: i32) -> (i32, i32) {
    %c0_i32 = arith.constant 0 : i32
    %c0_i32_0 = arith.constant 0 : i32
    return %arg0, %c0_i32 : i32, i32
  }
  func.func @transform_4(%arg0: i32, %arg1: i32) -> (i32, i32) {
    %c0_i32 = arith.constant 0 : i32
    return %arg0, %arg1 : i32, i32
  }
}

</mosaic_0001>

<bundles_post_ra>
// kernel: complex_exponential_forward_split.1
= control target key start
LH: loop header
LB: loop body
LE: loop exit
PB: predicated region body
PF: predicated region fallthrough
CT: control target
= control target key end

     0   :  { %s174_s0 = inlined_call_operand.vmem [shape: f32[8,128], index: 0, kind: input, shape index: {}]   ;;  %s175_s1 = inlined_call_operand.vmem [shape: f32[8,128], index: 1, kind: input, shape index: {}]   ;;  %s176_s2 = inlined_call_operand.vmem [shape: f32[1,128], index: 2, kind: input, shape index: {}]   ;;  %s177_s3 = inlined_call_operand.vmem [shape: f32[8,1], index: 3, kind: input, shape index: {}]   ;;  %s178_s4 = inlined_call_operand.hbm [shape: f32[8,128], index: 4, kind: output, shape index: {}]  }
   0x1   :  { %v19_v0 = vld [vmem:[%s177_s3] sm:$0xff] }
   0x2   :  { %9 = vsyncpa [#allocation3], 0  ;;  %v123_v1 = vmov 0   ;;  %v93_v2 = vld [vmem:[%s176_s2] ss:$0 sm:$0xff]  ;;  %s124_s21 = smov [#allocation2]  }
   0x3   :  { %98 = vset.pattern.permute.xlu0 %v123_v1  ;;  %v73_v42 = vld [vmem:[%s174_s0] sm:$0xff]  ;;  %s85_s22 = sshll.u32 %s124_s21, 4  ;;  %s86_s22 = int_to_ptr.vmem [resolvable:$true] %s85_s22 }
   0x4   :  { %28 = vperm.xlu0 %98, %v19_v0   ;;  %v75_v43 = vld [vmem:[%s175_s1] sm:$0xff]  ;;  %s99_s23 = scalar_lea.vmem %s86_s22, 128  ;;  %p104_p1 = scmp.lt.s32.totalorder %s86_s22, %s86_s22 }
   0x5   :  { %p100_p0 = scmp.ne.s32.totalorder %s86_s22, %s99_s23  ;;  %p105_p2 = scmp.lt.s32.totalorder %s99_s23, %s99_s23 }
   0x7   :  { %p106_p3 = por %p105_p2, %p104_p1 }
   0x9   :  { %p107_p4 = pnand %p106_p3, %p100_p0 }
  0x83   :  { %v29_v3 = vpop.permute.xlu0 %28 }
  0x84   :  { %v31_v4 = vmul.f32 %v93_v2, %v29_v3 }
  0x86   :  { %v32_v5 = vmul.f32 0.63661975, %v31_v4 }
  0x88   :  { %v33_v6 = vadd.f32 0.5, %v32_v5 }
  0x8a   :  { %v34_v7 = vfloor.f32 %v33_v6 }
  0x8c   :  { %v35_v8 = vmul.f32 1.5703125, %v34_v7  ;;  %v37_v10 = vmul.f32 0.0004837513, %v34_v7  ;;  %v39_v12 = vmul.f32 7.54979e-08, %v34_v7  ;;  %v94_v13 = vtrunc.f32 %v34_v7 }
  0x8e   :  { %v36_v9 = vsub.f32 %v31_v4, %v35_v8  ;;  %v95_v16 = vcvt.f32.s32 %v94_v13 }
  0x90   :  { %v38_v11 = vsub.f32 %v36_v9, %v37_v10  ;;  %v59_v21 = vand.u32 3, %v95_v16 }
  0x92   :  { %v40_v14 = vsub.f32 %v38_v11, %v39_v12  ;;  %v68_v29 = vadd.s32 1, %v59_v21  ;;  %v60_v31 = vand.u32 1, %v59_v21  ;;  %v64_v36 = vand.u32 2, %v59_v21 }
  0x94   :  { %v41_v15 = vmul.f32 %v40_v14, %v40_v14  ;;  %v69_v37 = vand.u32 2, %v68_v29  ;;  %vm61_vm0 = vcmp.ne.s32.totalorder %v60_v31, 0  ;;  %vm65_vm1 = vcmp.ne.s32.totalorder %v64_v36, 0 }
  0x96   :  { %v43_v17 = vmul.f32 -0.00019515296, %v41_v15  ;;  %v52_v18 = vmul.f32 2.4433157e-05, %v41_v15  ;;  %v49_v23 = vmul.f32 0.5, %v41_v15  ;;  %v42_v25 = vmul.f32 %v41_v15, %v40_v14 }
  0x97   :  { %v51_v27 = vmul.f32 %v41_v15, %v41_v15  ;;  %vm70_vm2 = vcmp.ne.s32.totalorder %v69_v37, 0 }
  0x98   :  { %v44_v19 = vadd.f32 0.008332161, %v43_v17  ;;  %v53_v20 = vadd.f32 -0.0013887316, %v52_v18  ;;  %v50_v32 = vsub.f32 1.0, %v49_v23 }
  0x9a   :  { %v45_v22 = vmul.f32 %v44_v19, %v41_v15  ;;  %v54_v24 = vmul.f32 %v53_v20, %v41_v15 }
  0x9c   :  { %v46_v26 = vadd.f32 -0.16666655, %v45_v22  ;;  %v55_v28 = vadd.f32 0.041666646, %v54_v24 }
  0x9e   :  { %v47_v30 = vmul.f32 %v46_v26, %v42_v25  ;;  %v56_v33 = vmul.f32 %v55_v28, %v51_v27 }
  0xa0   :  { %v48_v34 = vadd.f32 %v47_v30, %v40_v14  ;;  %v57_v35 = vadd.f32 %v56_v33, %v50_v32 }
  0xa2   :  { %v62_v38 = vsel %vm61_vm0, %v57_v35, %v48_v34  ;;  %v63_v39 = vsel %vm61_vm0, %v48_v34, %v57_v35 }
  0xa3   :  { %v66_v40 = vsub.f32 0.0, %v62_v38  ;;  %v71_v41 = vsub.f32 0.0, %v63_v39 }
  0xa5   :  { %v67_v44 = vsel %vm65_vm1, %v66_v40, %v62_v38  ;;  %v72_v45 = vsel %vm70_vm2, %v71_v41, %v63_v39 }
  0xa6   :  { %v74_v46 = vmul.f32 %v73_v42, %v72_v45  ;;  %v76_v47 = vmul.f32 %v75_v43, %v67_v44 }
  0xa8   :  { %v77_v48 = vsub.f32 %v74_v46, %v76_v47 }
  0xaa   :  { %78 = vst [vmem:[#allocation2] sm:$0xff] %v77_v48 }
  0xab   :  { %110 = shalt.err (!%p107_p4)
}
  0xac   :  { %s111_s24 = scalar_lea.hbm %s178_s4, 128 }
  0xad   :  { %p112_p5 = scmp.ne.s32.totalorder %s178_s4, %s111_s24  ;;  %p115_p6 = scmp.lt.u32.totalorder %s111_s24, %s178_s4 }
  0xaf   :  { %p117_p7 = pnand %p115_p6, %p112_p5 }
  0xb1   :  { %120 = shalt.err (!%p117_p7)
}
  0xb2   :  { %88 = dma.vmem_to_hbm [thread:$0]  %s86_s22, 128, %s178_s4, [#allocation3]  }
  0xb3   :  { %121 = dma.done.wait [#allocation3], 128  }
  0xb4   :  { %122 = vsyncadd [#allocation3], 4294967168 }
  0xb5   :  { %92 = vsyncpa [#allocation3], 1 }

</bundles_post_ra>
